<compile_context>
chip_gen: v7x
topology: tpu7x:2x2x1
jax: 0.10.0
libtpu: 0.0.40
codegen_flags: <defaults>
</compile_context>

<pallas_src>
import jax
import jax.numpy as jnp
from jax import lax
from jax.experimental import pallas as pl
from jax.experimental.pallas import tpu as pltpu

IN_FEATURES = 10
OUT_FEATURES = 5


def _device_vmem_bytes():
    """Physical VMEM per core; conservative (v7x, 64 MiB) fallback if unknown."""
    try:
        info = pltpu.get_tpu_info()
        cap = getattr(info, "vmem_capacity_bytes", None)
        if cap:
            return int(cap)
    except Exception:
        pass
    return 64 << 20  # v7x


# Generation-aware budgets: request half of physical VMEM as the scoped limit
# (v5e/v6e -> 64 MiB, v7x -> 32 MiB); the single-shot path may occupy at most
# half of that, leaving headroom for Mosaic scratch / spills.
_VMEM_PHYS = _device_vmem_bytes()
_VMEM_LIMIT = int(min(_VMEM_PHYS // 2, 64 << 20))
_SINGLE_SHOT_BUDGET = _VMEM_LIMIT // 2
_BYTES_PER_ROW = 4 * (IN_FEATURES + OUT_FEATURES)  # f32 x-row + y-row
_SINGLE_SHOT_MAX_B = max(8, _SINGLE_SHOT_BUDGET // _BYTES_PER_ROW)


def _linear_kernel(x_ref, w_ref, b_ref, o_ref):
    """y = x @ W^T + b, contracting K in-kernel.

    x:(B_or_bn, K)  w:(N, K) (PyTorch layout, untransposed)  b:(1, N)  o:(B_or_bn, N)
    """
    acc = lax.dot_general(
        x_ref[...],
        w_ref[...],
        dimension_numbers=(((1,), (1,)), ((), ())),
        preferred_element_type=jnp.float32,
        precision=lax.Precision.HIGHEST,
    )
    o_ref[...] = (acc + b_ref[...]).astype(o_ref.dtype)


def _linear_single_shot(x, w, b):
    """No-grid path: whole x / y resident in VMEM, single kernel invocation."""
    B, _ = x.shape
    N = w.shape[0]
    return pl.pallas_call(
        _linear_kernel,
        out_shape=jax.ShapeDtypeStruct((B, N), x.dtype),
        in_specs=[
            pl.BlockSpec(memory_space=pltpu.MemorySpace.VMEM),
            pl.BlockSpec(memory_space=pltpu.MemorySpace.VMEM),
            pl.BlockSpec(memory_space=pltpu.MemorySpace.VMEM),
        ],
        out_specs=pl.BlockSpec(memory_space=pltpu.MemorySpace.VMEM),
        compiler_params=pltpu.CompilerParams(vmem_limit_bytes=_VMEM_LIMIT),
    )(x, w, b.reshape(1, N))


def _linear_batch_tiled(x, w, b, *, bn):
    """Grid over the batch axis only; no wrapper transpose/pad, ragged tail OK."""
    B, K = x.shape
    N = w.shape[0]
    n_blocks = pl.cdiv(B, bn)
    return pl.pallas_call(
        _linear_kernel,
        out_shape=jax.ShapeDtypeStruct((B, N), x.dtype),
        grid=(n_blocks,),
        in_specs=[
            pl.BlockSpec((bn, K), lambda j: (j, 0)),  # x batch tile (K full-width)
            pl.BlockSpec((N, K), lambda j: (0, 0)),   # W: resident across steps
            pl.BlockSpec((1, N), lambda j: (0, 0)),   # bias: resident across steps
        ],
        out_specs=pl.BlockSpec((bn, N), lambda j: (j, 0)),
        compiler_params=pltpu.CompilerParams(
            dimension_semantics=("parallel",),  # shards batch across 2 TCs on v7x
            vmem_limit_bytes=_VMEM_LIMIT,
        ),
    )(x, w, b.reshape(1, N))


def small_pytorch_model_forward(x, w, b, *, batch_tile=8192):
    """Equivalent of SmallPytorchModel.forward: y = x @ W^T + b.

    x: (B, 10) f32;  w: (5, 10) f32 (PyTorch layout);  b: (5,) f32.
    """
    B = x.shape[0]
    if B <= _SINGLE_SHOT_MAX_B:
        return _linear_single_shot(x, w, b)
    # Fallback for very large B only.  Keep bn a multiple of 8 (sublane) and
    # aim for >= 2 blocks so the parallel axis can use both v7x TensorCores.
    bn = int(min(batch_tile, max(8, ((pl.cdiv(B, 2) + 7) // 8) * 8)))
    return _linear_batch_tiled(x, w, b, bn=bn)


if __name__ == "__main__":
    key = jax.random.PRNGKey(0)
    k_x, k_w, k_b, k_x2, k_x3 = jax.random.split(key, 5)

    # torch.nn.Linear(10, 5) default init: U(-1/sqrt(in), 1/sqrt(in))
    bound = 1.0 / jnp.sqrt(jnp.float32(IN_FEATURES))
    w = jax.random.uniform(k_w, (OUT_FEATURES, IN_FEATURES), jnp.float32, -bound, bound)
    b = jax.random.uniform(k_b, (OUT_FEATURES,), jnp.float32, -bound, bound)

    # 1) Small batch (typical usage): single-shot no-grid path.
    x_small = jax.random.normal(k_x, (8, IN_FEATURES), jnp.float32)
    y_small = jax.block_until_ready(small_pytorch_model_forward(x_small, w, b))
    assert y_small.shape == (8, OUT_FEATURES)
    assert jnp.allclose(y_small, x_small @ w.T + b, atol=1e-5, rtol=1e-5)

    # 2) Moderately large batch: still well under the VMEM-derived single-shot
    #    threshold, so it also takes the zero-overhead no-grid path.
    x_mid = jax.random.normal(k_x2, (512, IN_FEATURES), jnp.float32)
    y_mid = jax.block_until_ready(small_pytorch_model_forward(x_mid, w, b))
    assert y_mid.shape == (512, OUT_FEATURES)
    assert jnp.allclose(y_mid, x_mid @ w.T + b, atol=1e-5, rtol=1e-5)

    # 3) Explicitly exercise the batch-tiled grid path (including a ragged last
    #    block: 300 rows with bn=128 -> 3 blocks, last one masked on write).
    x_big = jax.random.normal(k_x3, (300, IN_FEATURES), jnp.float32)
    y_big = jax.block_until_ready(_linear_batch_tiled(x_big, w, b, bn=128))
    assert y_big.shape == (300, OUT_FEATURES)
    assert jnp.allclose(y_big, x_big @ w.T + b, atol=1e-4, rtol=1e-4)

    print("KERNEL_OK")
</pallas_src>

<mosaic_0001>
module attributes {stable_mosaic.version = 11 : i64} {
  func.func @_linear_kernel(%arg0: memref<8x10xf32, #tpu.memory_space<vmem>>, %arg1: memref<5x10xf32, #tpu.memory_space<vmem>>, %arg2: memref<1x5xf32, #tpu.memory_space<vmem>>, %arg3: memref<8x5xf32, #tpu.memory_space<vmem>>) attributes {dimension_semantics = [], scalar_prefetch = 0 : i64, scratch_operands = 0 : i64, tpu.core_type = #tpu.core_type<tc>} {
    %c0 = arith.constant 0 : index
    %c0_0 = arith.constant 0 : index
    %0 = vector.load %arg0[%c0, %c0_0] : memref<8x10xf32, #tpu.memory_space<vmem>>, vector<8x10xf32>
    %c0_1 = arith.constant 0 : index
    %c0_2 = arith.constant 0 : index
    %1 = vector.load %arg1[%c0_1, %c0_2] : memref<5x10xf32, #tpu.memory_space<vmem>>, vector<5x10xf32>
    %cst = arith.constant dense<0.000000e+00> : vector<8x5xf32>
    %2 = tpu.matmul %0, %1, %cst {dimension_numbers = #tpu.dot_dimension_numbers<[1], [1], [0], [0], [0, 0, 1, 0], [], []>, precision = #tpu.contract_precision<fp32>} : vector<8x10xf32>, vector<5x10xf32>, vector<8x5xf32> -> vector<8x5xf32>
    %c0_3 = arith.constant 0 : index
    %c0_4 = arith.constant 0 : index
    %3 = vector.load %arg2[%c0_3, %c0_4] : memref<1x5xf32, #tpu.memory_space<vmem>>, vector<1x5xf32>
    %4 = vector.broadcast %3 : vector<1x5xf32> to vector<8x5xf32>
    %5 = arith.addf %2, %4 : vector<8x5xf32>
    %c0_5 = arith.constant 0 : index
    %c0_6 = arith.constant 0 : index
    %6 = vector.load %arg3[%c0_5, %c0_6] : memref<8x5xf32, #tpu.memory_space<vmem>>, vector<8x5xf32>
    tpu.vector_store %arg3[%c0_5, %c0_6], %5 {strides = array<i32>} : memref<8x5xf32, #tpu.memory_space<vmem>>, vector<8x5xf32>,
    return
  }
}

</mosaic_0001>

<bundles_post_ra>
// kernel: tpu_custom_call.1
= control target key start
LH: loop header
LB: loop body
LE: loop exit
PB: predicated region body
PF: predicated region fallthrough
CT: control target
= control target key end

     0   :  { %8 = vsyncpa [#allocation3], 0  ;;  %s719_s0 = inlined_call_operand.hbm [shape: f32[8,10], index: 0, kind: input, shape index: {}]   ;;  %s720_s1 = inlined_call_operand.hbm [shape: f32[5,10], index: 1, kind: input, shape index: {}]   ;;  %s721_s2 = inlined_call_operand.vmem [shape: f32[1,5], index: 2, kind: input, shape index: {}]   ;;  %s722_s3 = inlined_call_operand.hbm [shape: f32[8,5], index: 3, kind: output, shape index: {}]  }
   0x1   :  { %9 = vsyncpa [#allocation6], 0 }
   0x2   :  { %10 = vsyncpa [#allocation4], 0  ;;  %s649_s12 = smov [#allocation2]   ;;  %s650_s14 = smov [#allocation5]  }
   0x3   :  { %s17_s13 = sshll.u32 %s649_s12, 4  ;;  %s27_s15 = sshll.u32 %s650_s14, 4  ;;  %s18_s13 = int_to_ptr.vmem [resolvable:$true] %s17_s13  ;;  %s28_s15 = int_to_ptr.vmem [resolvable:$true] %s27_s15 }
   0x4   :  { %s577_s18 = scalar_lea.hbm %s719_s0, 128 }
   0x5   :  { %p578_p0 = scmp.ne.s32.totalorder %s719_s0, %s577_s18  ;;  %p581_p1 = scmp.lt.u32.totalorder %s577_s18, %s719_s0 }
   0x7   :  { %p583_p2 = pnand %p581_p1, %p578_p0 }
   0x9   :  { %586 = shalt.err (!%p583_p2)
}
   0xa   :  { %s587_s23 = scalar_lea.vmem %s18_s13, 128  ;;  %p592_p4 = scmp.lt.s32.totalorder %s18_s13, %s18_s13 }
   0xb   :  { %p588_p3 = scmp.ne.s32.totalorder %s18_s13, %s587_s23  ;;  %p593_p5 = scmp.lt.s32.totalorder %s587_s23, %s587_s23 }
   0xd   :  { %p594_p6 = por %p593_p5, %p592_p4 }
   0xf   :  { %p595_p7 = pnand %p594_p6, %p588_p3 }
  0x11   :  { %598 = shalt.err (!%p595_p7)
}
  0x12   :  { %20 = dma.hbm_to_vmem [thread:$0]  %s719_s0, 128, %s18_s13, [#allocation3]  }
  0x13   :  { %s599_s28 = scalar_lea.hbm %s720_s1, 128 }
  0x14   :  { %p600_p8 = scmp.ne.s32.totalorder %s720_s1, %s599_s28  ;;  %p603_p9 = scmp.lt.u32.totalorder %s599_s28, %s720_s1 }
  0x16   :  { %p605_p10 = pnand %p603_p9, %p600_p8 }
  0x18   :  { %608 = shalt.err (!%p605_p10)
}
  0x19   :  { %s609_s6 = scalar_lea.vmem %s28_s15, 128  ;;  %p614_p12 = scmp.lt.s32.totalorder %s28_s15, %s28_s15 }
  0x1a   :  { %p610_p11 = scmp.ne.s32.totalorder %s28_s15, %s609_s6  ;;  %p615_p13 = scmp.lt.s32.totalorder %s609_s6, %s609_s6 }
  0x1c   :  { %p616_p0 = por %p615_p13, %p614_p12 }
  0x1e   :  { %p617_p1 = pnand %p616_p0, %p610_p11 }
  0x20   :  { %620 = shalt.err (!%p617_p1)
}
  0x21   :  { %30 = dma.hbm_to_vmem [thread:$0]  %s720_s1, 128, %s28_s15, [#allocation6]  }
  0x22   :  { %643 = dma.done.wait [#allocation3], 128  }
  0x23   :  { %644 = vsyncadd [#allocation3], 4294967168 }
  0x24   :  { %645 = dma.done.wait [#allocation6], 128  }
  0x25   :  { %646 = vsyncadd [#allocation6], 4294967168  ;;  %v651_v0 = vmov 0.0   ;;  %vm652_vm0 = vmmov 0   ;;  %vm48_vm1 = vcmask 80896   ;;  %v39_v2 = vld [vmem:[#allocation2] sm:$0xff] }
  0x26   :  { %547 = vmatprep.subr.mxu0 %v651_v0  ;;  %532 = vmatprep.subr.mxu1 %v651_v0  ;;  %v40_v1 = vld [vmem:[#allocation5] sm:$0x1f]  ;;  %v50_v4 = vsel %vm48_vm1, %v39_v2, 0  ;;  %v519_v17 = vld [vmem:[%s721_s2] ss:$0 sm:$0xff]  ;;  %s653_s9 = smov [#allocation7]  }
  0x27   :  { %549 = vmatprep.mubr.msk.f32.mxu0 %vm652_vm0, %v651_v0  ;;  %534 = vmatprep.mubr.msk.f32.mxu1 %vm652_vm0, %v651_v0  ;;  %v53_v3 = vsel %vm48_vm1, %v40_v1, 0  ;;  %v121_v6 = vand.u32 4294901760, %v50_v4  ;;  %s509_s10 = sshll.u32 %s653_s9, 4  ;;  %vm501_vm2 = vcmask 39936   ;;  %s510_s10 = int_to_ptr.vmem [resolvable:$true] %s509_s10 }
  0x28   :  { %v56_v5 = vand.u32 4294901760, %v53_v3  ;;  %s621_s11 = scalar_lea.vmem %s510_s10, 128  ;;  %p626_p3 = scmp.lt.s32.totalorder %s510_s10, %s510_s10 }
  0x29   :  { %v122_v8 = vsub.f32 %v50_v4, %v121_v6  ;;  %p622_p2 = scmp.ne.s32.totalorder %s510_s10, %s621_s11  ;;  %p627_p4 = scmp.lt.s32.totalorder %s621_s11, %s621_s11 }
  0x2a   :  { %v133_v7 = vsub.f32 %v53_v3, %v56_v5  ;;  %548 = vmatpush3.xpose.msra.mxu0 %v56_v5  ;;  %533 = vmatpush3.xpose.msra.mxu1 %v56_v5 }
  0x2b   :  { %537 = vmatprep.subr.mxu1 %v651_v0  ;;  %552 = vmatprep.subr.mxu0 %v651_v0  ;;  %v123_v9 = vand.u32 4294901760, %v122_v8  ;;  %p628_p5 = por %p627_p4, %p626_p3 }
  0x2c   :  { %v134_v10 = vand.u32 4294901760, %v133_v7 }
  0x2d   :  { %550 = vmatmul.mubr.f32.vlgmr.msra.gmra.mrb[0].mxu0 %v123_v9  ;;  %v124_v11 = vsub.f32 %v122_v8, %v123_v9  ;;  %p629_p6 = pnand %p628_p5, %p622_p2 }
  0x2e   :  { %v135_v12 = vsub.f32 %v133_v7, %v134_v10  ;;  %553 = vmatpush3.xpose.msra.mxu0 %v134_v10  ;;  %554 = vmatprep.mubr.msk.f32.mxu0 %vm652_vm0, %v651_v0 }
  0x2f   :  { %v125_v13 = vand.u32 4294901760, %v124_v11  ;;  %557 = vmatprep.subr.mxu0 %v651_v0 }
  0x30   :  { %v136_v14 = vand.u32 4294901760, %v135_v12 }
  0x31   :  { %535 = vmatmul.mubr.f32.vlgmr.msra.gmra.mrb[0].mxu1 %v125_v13 }
  0x32   :  { %538 = vmatpush3.xpose.msra.mxu1 %v136_v14  ;;  %539 = vmatprep.mubr.msk.f32.mxu1 %vm652_vm0, %v651_v0 }
  0x33   :  { %542 = vmatprep.subr.mxu1 %v651_v0 }
  0x35   :  { %555 = vmatmul.mubr.f32.vlgmr.msra.gmra.mrb[0].mxu0 %v121_v6 }
  0x36   :  { %558 = vmatpush3.xpose.msra.mxu0 %v56_v5  ;;  %559 = vmatprep.mubr.msk.f32.mxu0 %vm652_vm0, %v651_v0 }
  0x39   :  { %540 = vmatmul.mubr.f32.vlgmr.msra.gmra.mrb[0].mxu1 %v121_v6 }
  0x3a   :  { %543 = vmatpush3.xpose.msra.mxu1 %v133_v7  ;;  %544 = vmatprep.mubr.msk.f32.mxu1 %vm652_vm0, %v651_v0 }
  0x3d   :  { %560 = vmatmul.mubr.f32.vlgmr.msra.gmra.mrb[0].mxu0 %v121_v6 }
  0x41   :  { %545 = vmatmul.mubr.f32.vlgmr.msra.gmra.mrb[0].mxu1 %v122_v8 }
 0x110   :  { %v497_v15 = vpop.f32.mrb[0].mxu0 }
 0x111   :  { %v561_v16 = vpop.f32.mrb[1].mxu0 }
 0x114   :  { %v277_v18 = vpop.f32.mrb[0].mxu1 }
 0x115   :  { %v562_v19 = vadd.f32 %v519_v17, %v277_v18  ;;  %v546_v20 = vpop.f32.mrb[1].mxu1 }
 0x117   :  { %v563_v21 = vadd.f32 %v562_v19, %v497_v15 }
 0x119   :  { %502 = vst.msk [vmem:[#allocation7] sm:$0xff] %vm501_vm2, %v563_v21 }
 0x11a   :  { %632 = shalt.err (!%p629_p6)
}
 0x11b   :  { %s633_s2 = scalar_lea.hbm %s722_s3, 128 }
 0x11c   :  { %p634_p7 = scmp.ne.s32.totalorder %s722_s3, %s633_s2  ;;  %p637_p8 = scmp.lt.u32.totalorder %s633_s2, %s722_s3 }
 0x11e   :  { %p639_p9 = pnand %p637_p8, %p634_p7 }
 0x120   :  { %642 = shalt.err (!%p639_p9)
}
 0x121   :  { %512 = dma.vmem_to_hbm [thread:$0]  %s510_s10, 128, %s722_s3, [#allocation4]  }
 0x122   :  { %647 = dma.done.wait [#allocation4], 128  }
 0x123   :  { %648 = vsyncadd [#allocation4], 4294967168 }
 0x124   :  { %516 = vsyncpa [#allocation3], 1 }
 0x125   :  { %517 = vsyncpa [#allocation6], 1 }
 0x126   :  { %518 = vsyncpa [#allocation4], 1 }

</bundles_post_ra>
